<compile_context>
chip_gen: v6e
topology: v6e:2x2x1
jax: 0.10.0
libtpu: 0.0.40
codegen_flags: <defaults>
</compile_context>

<pallas_src>
import functools

import jax
import jax.numpy as jnp
from jax.experimental import pallas as pl
from jax.experimental.pallas import tpu as pltpu

KSIZE = 7
PAD = KSIZE // 2


# ---------------------------------------------------------------------------
# Sizing helpers
# ---------------------------------------------------------------------------
def _vmem_limits():
    """Per-generation scoped-VMEM limit and per-block budget."""
    try:
        cap = pltpu.get_tpu_info().vmem_capacity_bytes
    except Exception:
        cap = None
    if not cap:
        cap = 64 * 1024 * 1024                       # conservative fallback (v7x per-TC VMEM)
    # ~96 MiB on v5e/v6e (128 MiB physical), ~48 MiB on v7x (64 MiB physical).
    limit = min(int(cap * 3 // 4), 96 * 1024 * 1024)
    block_budget = limit // 5                        # double-buffered in + out + headroom
    return limit, block_budget


def _pick_c_block(C, bytes_per_channel, budget, n_outer,
                  min_steps=8, min_block=512 * 1024):
    """Largest legal C tile that fits the budget while leaving enough grid steps
    for pipelining / 2-TC sharding, without dropping blocks below ~0.5 MiB."""
    valid = sorted([tc for tc in range(1, C + 1)
                    if C % tc == 0 and (tc == C or tc % 8 == 0)], reverse=True)
    fitting = [tc for tc in valid if tc * bytes_per_channel <= budget]
    if not fitting:
        # Smallest legal tile; if it still exceeds the VMEM limit this fails
        # loudly at compile time rather than silently.
        fitting = valid[-1:]
    smallest = min(fitting)
    for want in (min_steps, 2):
        cands = [tc for tc in fitting
                 if n_outer * (C // tc) >= want
                 and (tc * bytes_per_channel >= min_block or tc == smallest)]
        if cands:
            return cands[0]
    return fitting[0]


# ---------------------------------------------------------------------------
# Pass 1: lane-dense channel sum / max over flat HW
# ---------------------------------------------------------------------------
def _reduce_kernel(curr_ref, sum_ref, max_ref):
    # curr_ref: VMEM (1, tc, band_hw)   one C tile of one HW band (lane-dense)
    # sum_ref : VMEM (1, 1, band_hw) f32  resident accumulator across the C axis
    # max_ref : VMEM (1, 1, band_hw) f32  resident accumulator across the C axis
    c = pl.program_id(2)
    x = curr_ref[0]                                                  # (tc, band_hw), input dtype
    part_sum = jnp.sum(x, axis=0, keepdims=True, dtype=jnp.float32)  # no full-tile f32 copy
    part_max = jnp.max(x, axis=0, keepdims=True).astype(jnp.float32)

    @pl.when(c == 0)
    def _init():
        sum_ref[0] = part_sum
        max_ref[0] = part_max

    @pl.when(c > 0)
    def _acc():
        sum_ref[0] = sum_ref[0] + part_sum
        max_ref[0] = jnp.maximum(max_ref[0], part_max)


# ---------------------------------------------------------------------------
# Pass 2: tiny per-image 7x7 conv + sigmoid on the (H, W) maps
# ---------------------------------------------------------------------------
def _conv_sigmoid_kernel(w_ref, sum_ref, max_ref, att_ref, pa_ref, pm_ref):
    # w_ref   : SMEM (2*49,) f32 conv weights; avg-channel weights pre-scaled by 1/C
    # sum/max : VMEM (1, 1, H, W) f32 channel-sum / channel-max maps
    # att_ref : VMEM (1, 1, H, W) f32 attention map output
    # pa/pm   : VMEM (H+2P, W+2P) f32 zero-padded conv inputs (scratch)
    _, _, H, W = sum_ref.shape
    # This pass is once-per-image and tiny, so re-zeroing the padded buffers here is
    # essentially free and keeps correctness independent of grid sharding.
    pa_ref[...] = jnp.zeros((H + 2 * PAD, W + 2 * PAD), jnp.float32)
    pm_ref[...] = jnp.zeros((H + 2 * PAD, W + 2 * PAD), jnp.float32)
    pa_ref[PAD:PAD + H, PAD:PAD + W] = sum_ref[0, 0]
    pm_ref[PAD:PAD + H, PAD:PAD + W] = max_ref[0, 0]

    y = jnp.zeros((H, W), jnp.float32)
    # kj (lane direction) hoisted out of the ki loop: 7 lane-shifted column slabs per
    # map instead of 49; the 7 ki slices inside are sublane-only.  (For very large
    # maps a pltpu.roll-based shift would offload this to the XLU; not needed here.)
    for kj in range(KSIZE):
        a_col = pa_ref[:, kj:kj + W]                                 # (H + 2*PAD, W)
        m_col = pm_ref[:, kj:kj + W]
        for ki in range(KSIZE):
            w_a = w_ref[0 * KSIZE * KSIZE + ki * KSIZE + kj]
            w_m = w_ref[1 * KSIZE * KSIZE + ki * KSIZE + kj]
            y = y + w_a * a_col[ki:ki + H, :] + w_m * m_col[ki:ki + H, :]

    att_ref[0, 0] = jax.nn.sigmoid(y)


# ---------------------------------------------------------------------------
# Pass 3: lane-dense apply  out = att * prev  on (N, C, H*W)
# ---------------------------------------------------------------------------
def _apply_kernel(att_ref, prev_ref, out_ref, *, compute_dtype):
    # att_ref : VMEM (1, 1, HW) f32
    # prev_ref: VMEM (1, tc, HW)
    # out_ref : VMEM (1, tc, HW)
    att = att_ref[0].astype(compute_dtype)                           # (1, HW) sublane broadcast
    out_ref[0] = (prev_ref[0].astype(compute_dtype) * att).astype(out_ref.dtype)


# ---------------------------------------------------------------------------
# Wrapper
# ---------------------------------------------------------------------------
def spatial_attention_mtf(curr, prev, conv_weight):
    """curr, prev: (N, C, H, W); conv_weight: (1, 2, 7, 7) as in nn.Conv2d(2, 1, 7, bias=False)."""
    N, C, H, W = curr.shape
    HW = H * W
    vmem_limit, block_budget = _vmem_limits()

    # Fold the 1/C of the channel mean into the avg-channel weights (conv is linear),
    # so pass 1 only emits the raw channel sum.
    w = conv_weight.astype(jnp.float32).reshape(2, KSIZE * KSIZE)
    w = w * jnp.array([[1.0 / C], [1.0]], dtype=jnp.float32)
    w_flat = w.reshape(-1)                                           # (98,) -> SMEM

    # Lane-dense views: contiguous reshapes of row-major buffers (layout plumbing only).
    curr_flat = curr.reshape(N, C, HW)
    prev_flat = prev.reshape(N, C, HW)

    # ---- Pass 1: channel sum/max reduction, lane-dense over flat HW ------------------
    # HW bands feed the second TensorCore on v7x when N == 1 (bands must stay 128-lane
    # aligned; if HW isn't splittable we fall back to a single band).
    nb = 2 if (N == 1 and HW % 256 == 0) else 1
    band_hw = HW // nb
    tc_a = _pick_c_block(C, band_hw * curr.dtype.itemsize, block_budget, N * nb)
    grid_a = (N, nb, C // tc_a)

    sum_map, max_map = pl.pallas_call(
        _reduce_kernel,
        out_shape=(jax.ShapeDtypeStruct((N, 1, HW), jnp.float32),
                   jax.ShapeDtypeStruct((N, 1, HW), jnp.float32)),
        grid=grid_a,
        in_specs=[pl.BlockSpec((1, tc_a, band_hw), lambda n, b, c: (n, c, b))],
        out_specs=(pl.BlockSpec((1, 1, band_hw), lambda n, b, c: (n, 0, b)),
                   pl.BlockSpec((1, 1, band_hw), lambda n, b, c: (n, 0, b))),
        compiler_params=pltpu.CompilerParams(
            dimension_semantics=("parallel", "parallel", "arbitrary"),
            vmem_limit_bytes=vmem_limit),
    )(curr_flat)

    # ---- Pass 2: tiny per-image conv + sigmoid ----------------------------------------
    # sum/max maps are N*HW f32 each — negligible traffic; the reshapes below are
    # contiguous (metadata-level) and off the heavy data path.
    att = pl.pallas_call(
        _conv_sigmoid_kernel,
        out_shape=jax.ShapeDtypeStruct((N, 1, H, W), jnp.float32),
        grid=(N,),
        in_specs=[
            pl.BlockSpec(memory_space=pltpu.MemorySpace.SMEM),       # conv weights (whole, SMEM)
            pl.BlockSpec((1, 1, H, W), lambda n: (n, 0, 0, 0)),      # channel-sum map
            pl.BlockSpec((1, 1, H, W), lambda n: (n, 0, 0, 0)),      # channel-max map
        ],
        out_specs=pl.BlockSpec((1, 1, H, W), lambda n: (n, 0, 0, 0)),
        scratch_shapes=[
            pltpu.VMEM((H + 2 * PAD, W + 2 * PAD), jnp.float32),     # zero-padded avg input
            pltpu.VMEM((H + 2 * PAD, W + 2 * PAD), jnp.float32),     # zero-padded max input
        ],
        compiler_params=pltpu.CompilerParams(
            dimension_semantics=("parallel",),
            vmem_limit_bytes=vmem_limit),
    )(w_flat, sum_map.reshape(N, 1, H, W), max_map.reshape(N, 1, H, W))

    # ---- Pass 3: lane-dense apply ------------------------------------------------------
    att_flat = att.reshape(N, 1, HW)
    tc_b = _pick_c_block(C, HW * prev.dtype.itemsize, block_budget, N)
    grid_b = (N, C // tc_b)
    # bf16 multiply on bf16 inputs (native VPU on v6e/v7x, halves vreg pressure);
    # f32 everywhere else so the f32 path matches the reference bit-for-bit.
    compute_dtype = jnp.bfloat16 if prev.dtype == jnp.bfloat16 else jnp.float32

    out_flat = pl.pallas_call(
        functools.partial(_apply_kernel, compute_dtype=compute_dtype),
        out_shape=jax.ShapeDtypeStruct((N, C, HW), prev.dtype),
        grid=grid_b,
        in_specs=[
            pl.BlockSpec((1, 1, HW), lambda n, c: (n, 0, 0)),        # att row (broadcast)
            pl.BlockSpec((1, tc_b, HW), lambda n, c: (n, c, 0)),     # prev C tile
        ],
        out_specs=pl.BlockSpec((1, tc_b, HW), lambda n, c: (n, c, 0)),
        compiler_params=pltpu.CompilerParams(
            dimension_semantics=("parallel", "parallel"),
            vmem_limit_bytes=vmem_limit),
    )(att_flat, prev_flat)

    return out_flat.reshape(N, C, H, W)


# ---------------------------------------------------------------------------
# Reference & test
# ---------------------------------------------------------------------------
def _reference(curr, prev, conv_weight):
    avg = jnp.mean(curr, axis=1, keepdims=True)
    mx = jnp.max(curr, axis=1, keepdims=True)
    y = jnp.concatenate([avg, mx], axis=1)                           # (N,2,H,W)
    y = jax.lax.conv_general_dilated(
        y, conv_weight, window_strides=(1, 1), padding=((PAD, PAD), (PAD, PAD)),
        dimension_numbers=("NCHW", "OIHW", "NCHW"))
    return jax.nn.sigmoid(y) * prev


if __name__ == "__main__":
    key = jax.random.PRNGKey(0)
    k1, k2, k3 = jax.random.split(key, 3)

    N, C, H, W = 2, 4, 16, 16
    curr = jax.random.normal(k1, (N, C, H, W), dtype=jnp.float32)
    prev = jax.random.normal(k2, (N, C, H, W), dtype=jnp.float32)
    # nn.Conv2d(2, 1, 7, bias=False) weight shape: (1, 2, 7, 7)
    conv_weight = 0.05 * jax.random.normal(k3, (1, 2, KSIZE, KSIZE), dtype=jnp.float32)

    out = jax.block_until_ready(spatial_attention_mtf(curr, prev, conv_weight))

    ref = jax.block_until_ready(_reference(curr, prev, conv_weight))
    assert out.shape == (N, C, H, W)
    assert jnp.allclose(out, ref, atol=1e-5, rtol=1e-5), "mismatch vs JAX reference"

    print("KERNEL_OK")
</pallas_src>

<mosaic_0001>
module attributes {stable_mosaic.version = 11 : i64} {
  func.func @_reduce_kernel(%arg0: i32, %arg1: i32, %arg2: i32, %arg3: memref<1x4x256xf32, #tpu.memory_space<vmem>>, %arg4: memref<1x1x256xf32, #tpu.memory_space<vmem>>, %arg5: memref<1x1x256xf32, #tpu.memory_space<vmem>>) attributes {dimension_semantics = [#tpu.dimension_semantics<parallel>, #tpu.dimension_semantics<parallel>, #tpu.dimension_semantics<arbitrary>], iteration_bounds = array<i64: 2, 1, 1>, scalar_prefetch = 0 : i64, scratch_operands = 0 : i64, tpu.core_type = #tpu.core_type<tc>, window_params = [{transform_indices = @transform_0, window_bounds = array<i64: 1, 4, 256>}, {transform_indices = @transform_1, window_bounds = array<i64: 1, 1, 256>}, {transform_indices = @transform_2, window_bounds = array<i64: 1, 1, 256>}]} {
    %c0 = arith.constant 0 : index
    %c0_0 = arith.constant 0 : index
    %c0_1 = arith.constant 0 : index
    %0 = vector.load %arg3[%c0, %c0_0, %c0_1] : memref<1x4x256xf32, #tpu.memory_space<vmem>>, vector<1x4x256xf32>
    %1 = vector.shape_cast %0 : vector<1x4x256xf32> to vector<4x256xf32>
    %cst = arith.constant dense<0.000000e+00> : vector<256xf32>
    %2 = vector.multi_reduction <add>, %1, %cst [0] : vector<4x256xf32> to vector<256xf32>
    %3 = vector.shape_cast %2 : vector<256xf32> to vector<1x256xf32>
    %cst_2 = arith.constant dense<0xFF800000> : vector<256xf32>
    %4 = vector.multi_reduction <maximumf>, %1, %cst_2 [0] : vector<4x256xf32> to vector<256xf32>
    %5 = vector.shape_cast %4 : vector<256xf32> to vector<1x256xf32>
    %c0_i32 = arith.constant 0 : i32
    %6 = arith.cmpi eq, %arg2, %c0_i32 : i32
    %7 = arith.extui %6 : i1 to i32
    %c0_i32_3 = arith.constant 0 : i32
    %8 = arith.cmpi ne, %7, %c0_i32_3 : i32
    scf.if %8 {
      %c0_6 = arith.constant 0 : index
      %c0_7 = arith.constant 0 : index
      %c0_8 = arith.constant 0 : index
      %12 = vector.load %arg4[%c0_6, %c0_7, %c0_8] : memref<1x1x256xf32, #tpu.memory_space<vmem>>, vector<1x1x256xf32>
      %13 = vector.shape_cast %12 : vector<1x1x256xf32> to vector<1x256xf32>
      %14 = vector.shape_cast %3 : vector<1x256xf32> to vector<1x1x256xf32>
      tpu.vector_store %arg4[%c0_6, %c0_7, %c0_8], %14 {strides = array<i32>} : memref<1x1x256xf32, #tpu.memory_space<vmem>>, vector<1x1x256xf32>,
      %c0_9 = arith.constant 0 : index
      %c0_10 = arith.constant 0 : index
      %c0_11 = arith.constant 0 : index
      %15 = vector.load %arg5[%c0_9, %c0_10, %c0_11] : memref<1x1x256xf32, #tpu.memory_space<vmem>>, vector<1x1x256xf32>
      %16 = vector.shape_cast %15 : vector<1x1x256xf32> to vector<1x256xf32>
      %17 = vector.shape_cast %5 : vector<1x256xf32> to vector<1x1x256xf32>
      tpu.vector_store %arg5[%c0_9, %c0_10, %c0_11], %17 {strides = array<i32>} : memref<1x1x256xf32, #tpu.memory_space<vmem>>, vector<1x1x256xf32>,
    } else {
    }
    %c0_i32_4 = arith.constant 0 : i32
    %9 = arith.cmpi sgt, %arg2, %c0_i32_4 : i32
    %10 = arith.extui %9 : i1 to i32
    %c0_i32_5 = arith.constant 0 : i32
    %11 = arith.cmpi ne, %10, %c0_i32_5 : i32
    scf.if %11 {
      %c0_6 = arith.constant 0 : index
      %c0_7 = arith.constant 0 : index
      %c0_8 = arith.constant 0 : index
      %12 = vector.load %arg4[%c0_6, %c0_7, %c0_8] : memref<1x1x256xf32, #tpu.memory_space<vmem>>, vector<1x1x256xf32>
      %13 = vector.shape_cast %12 : vector<1x1x256xf32> to vector<1x256xf32>
      %14 = arith.addf %13, %3 : vector<1x256xf32>
      %c0_9 = arith.constant 0 : index
      %c0_10 = arith.constant 0 : index
      %c0_11 = arith.constant 0 : index
      %15 = vector.load %arg4[%c0_9, %c0_10, %c0_11] : memref<1x1x256xf32, #tpu.memory_space<vmem>>, vector<1x1x256xf32>
      %16 = vector.shape_cast %15 : vector<1x1x256xf32> to vector<1x256xf32>
      %17 = vector.shape_cast %14 : vector<1x256xf32> to vector<1x1x256xf32>
      tpu.vector_store %arg4[%c0_9, %c0_10, %c0_11], %17 {strides = array<i32>} : memref<1x1x256xf32, #tpu.memory_space<vmem>>, vector<1x1x256xf32>,
      %c0_12 = arith.constant 0 : index
      %c0_13 = arith.constant 0 : index
      %c0_14 = arith.constant 0 : index
      %18 = vector.load %arg5[%c0_12, %c0_13, %c0_14] : memref<1x1x256xf32, #tpu.memory_space<vmem>>, vector<1x1x256xf32>
      %19 = vector.shape_cast %18 : vector<1x1x256xf32> to vector<1x256xf32>
      %20 = arith.maximumf %19, %5 : vector<1x256xf32>
      %c0_15 = arith.constant 0 : index
      %c0_16 = arith.constant 0 : index
      %c0_17 = arith.constant 0 : index
      %21 = vector.load %arg5[%c0_15, %c0_16, %c0_17] : memref<1x1x256xf32, #tpu.memory_space<vmem>>, vector<1x1x256xf32>
      %22 = vector.shape_cast %21 : vector<1x1x256xf32> to vector<1x256xf32>
      %23 = vector.shape_cast %20 : vector<1x256xf32> to vector<1x1x256xf32>
      tpu.vector_store %arg5[%c0_15, %c0_16, %c0_17], %23 {strides = array<i32>} : memref<1x1x256xf32, #tpu.memory_space<vmem>>, vector<1x1x256xf32>,
    } else {
    }
    return
  }
  func.func @transform_0(%arg0: i32, %arg1: i32, %arg2: i32) -> (i32, i32, i32) {
    %c0_i32 = arith.constant 0 : i32
    return %arg0, %arg2, %arg1 : i32, i32, i32
  }
  func.func @transform_1(%arg0: i32, %arg1: i32, %arg2: i32) -> (i32, i32, i32) {
    %c0_i32 = arith.constant 0 : i32
    %c0_i32_0 = arith.constant 0 : i32
    return %arg0, %c0_i32, %arg1 : i32, i32, i32
  }
  func.func @transform_2(%arg0: i32, %arg1: i32, %arg2: i32) -> (i32, i32, i32) {
    %c0_i32 = arith.constant 0 : i32
    %c0_i32_0 = arith.constant 0 : i32
    return %arg0, %c0_i32, %arg1 : i32, i32, i32
  }
}

</mosaic_0001>

<bundles_post_ra>
// kernel: tpu_custom_call.1
= control target key start
LH: loop header
LB: loop body
LE: loop exit
PB: predicated region body
PF: predicated region fallthrough
CT: control target
= control target key end

     0   :  { %8 = vsyncpa [#allocation3], 0  ;;  %s921_s0 = inlined_call_operand.hbm [shape: f32[2,4,256], index: 0, kind: input, shape index: {}]   ;;  %s922_s1 = inlined_call_operand.hbm [shape: f32[2,1,256], index: 1, kind: output, shape index: {0}]   ;;  %s923_s2 = inlined_call_operand.hbm [shape: f32[2,1,256], index: 2, kind: output, shape index: {1}]  }
   0x1   :  { %10 = vsyncpa [#allocation3 + $0x1], 0 }
   0x2   :  { %11 = vsyncpa [#allocation4], 0 }
   0x3   :  { %13 = vsyncpa [#allocation4 + $0x1], 0 }
   0x4   :  { %14 = vsyncpa [#allocation7], 0 }
   0x5   :  { %16 = vsyncpa [#allocation7 + $0x1], 0  ;;  %s746_s9 = smov 0   ;;  %s748_s10 = smov 0  }
   0x6   :  { %s750_s11 = smov 0   ;;  %s752_s12 = smov 0  }
   0x7   :  { %s754_s13 = smov 0   ;;  %s756_s14 = smov 0  }
   0x8 LB: > { %s496_s15 = sadd.s32 4294967295, %s725_s14   ;;  %s497_s16 = sadd.s32 4294967294, %s725_s14   ;;  %s725_s14 = sphi %s756_s14, %s22_s14   ;;  %s721_s13 = sphi %s754_s13, %s935_s13   ;;  %s717_s12 = sphi %s752_s12, %s934_s12   ;;  %s713_s11 = sphi %s750_s11, %s933_s11   ;;  %s709_s10 = sphi %s748_s10, %s932_s10   ;;  %s705_s9 = sphi %s746_s9, %s931_s9  }
   0x9   : > { %s41_s17 = sadd.s32 1, %s721_s13  ;;  %s52_s18 = sadd.s32 1, %s713_s11 }
   0xa   : > { %p43_p0 = scmp.ge.s32.totalorder %s41_s17, 2  ;;  %p59_p1 = scmp.ne.s32.totalorder %s713_s11, %s709_s10 }
   0xb   : > { %p60_p2 = scmp.eq.s32.totalorder %s725_s14, 0  ;;  %p65_p3 = scmp.ne.s32.totalorder %s709_s10, %s705_s9 }
   0xc   : > { %s937_s17 = smov (%p43_p0, %s41_s17), 0  ;;  %p66_p5 = scmp.eq.s32.totalorder %s496_s15, 0 }
   0xd   : > { %p787_p4 = por %p60_p2, %p59_p1  ;;  %s45_s20 = ssub.s32 %s721_s13, %s937_s17 }
   0xe   : > { %p91_p6 = scmp.eq.s32.totalorder %s496_s15, 1  ;;  %p50_p7 = scmp.eq.s32.totalorder %s45_s20, 0 }
   0xf   : > { %p793_p8 = por %p66_p5, %p65_p3  ;;  %p97_p10 = scmp.eq.s32.totalorder %s497_s16, 1 }
  0x10   : > { %p797_p9 = por %p91_p6, %p59_p1  ;;  %p535_p13 = scmp.lt.s32.totalorder %s725_s14, 2 }
  0x11   : > { %s802_s23 = scalar_select %p50_p7, %s713_s11, %s52_s18  }
  0x12   : > { %p804_p11 = por %p97_p10, %p65_p3  ;;  %s145_s25 = sand.u32 1, %s713_s11  }
  0x13   : > { %s500_s26 = sshll.u32 %s145_s25, 3  ;;  %s515_s27 = sshll.u32 %s721_s13, 7 }
  0x14   : > { %s927_s24 = scalar_select %p804_p11, 1, 0 }
  0x15   : > { %s159_s30 = scalar_lea.hbm %s921_s0, %s515_s27  ;;  %s149_s3 = scalar_lea.vmem [#allocation2], %s500_s26 }
  0x16   : > { %s161_s4 = sshll.u32 %s149_s3, 4  ;;  %p817_p0 = pnand %p535_p13, %p787_p4  ;;  %s162_s4 = int_to_ptr.vmem [resolvable:$true] %s161_s4 }
  0x17   : > { %p503_p1 = scmp.ge.s32.totalorder %s725_s14, 1  ;;  %p166_p2 = scmp.lt.s32.totalorder %s725_s14, 3 }
  0x18   : > { %s146_s6 = scalar_lea.sflag [#allocation3], %s145_s25  ;;  %p589_p3 = pneg %p817_p0 }
  0x19   : > { %s600_s7 = scalar_lea.vmem %s162_s4, 128  ;;  %s727_s8 = smov [#allocation2]  }
  0x1a   : > { %p601_p5 = scmp.ne.s32.totalorder %s162_s4, %s600_s7  ;;  %s605_s15 = sshll.u32 %s727_s8, 4  ;;  %s606_s15 = int_to_ptr.vmem [resolvable:$false] %s605_s15 }
  0x1b   : > { %s607_s16 = scalar_lea.vmem %s606_s15, 256  ;;  %p608_p10 = scmp.lt.s32.totalorder %s162_s4, %s606_s15 }
  0x1c   : > { %p603_p6 = pnand %p601_p5, %p589_p3  ;;  %p609_p12 = scmp.lt.s32.totalorder %s607_s16, %s600_s7 }
  0x1e   : > { %p604_p7 = pneg %p603_p6  ;;  %p610_p4 = por %p609_p12, %p608_p10 }
  0x20   : > { %p611_p13 = pnand %p610_p4, %p604_p7 }
  0x22   : > { %614 = shalt.err (!%p611_p13)
}
  0x23   : > { %527 = dma.hbm_to_vmem [thread:$0]  (!%p817_p0), %s159_s30, 128, %s162_s4, %s146_s6  }
  0x24   : > { %p167_p11 = pnand %p503_p1, %p166_p2 }
  0x25   : > { %s832_s18 = sand.u32 (!%p167_p11), 1, %s709_s10  }
  0x26   : > { %170 = sbr.rel (%p167_p11) target bundleno = 101 (0x65), region = 24  ;;  %s504_s19 = sshll.u32 (!%p167_p11), %s832_s18, 3 }
  0x27   : > { %s173_s20 = scalar_lea.sflag (!%p167_p11), [#allocation3], %s832_s18  ;;  %s176_s25 = scalar_lea.vmem (!%p167_p11), [#allocation2], %s504_s19 }
  0x2b   : > { %692 = dma.done.wait (%p793_p8), %s173_s20, 128  }
  0x2c   : > { %694 = vsyncadd (%p793_p8), %s173_s20, 4294967168  ;;  %vm209_vm0 = vcmask 1043456   ;;  %v205_v0 = vld [vmem:[%s176_s25] sm:$0xff]  ;;  %v728_v12 = vmov 1966171168   ;;  %v248_v14 = vlaneseq  ;;  %s505_s21 = sshll.u32 %s832_s18, 1 }
  0x2d   : > { %v207_v1 = vcombine.high %v205_v0, %v205_v0  ;;  %v210_v2 = vsel %vm209_vm0, %v205_v0, 0.0  ;;  %v224_v3 = vsel %vm209_vm0, %v205_v0, -inf  ;;  %v246_v13 = vunpack.c.l.s4 %v728_v12  ;;  %s194_s26 = scalar_lea.vmem [#allocation5], %s505_s21  ;;  %s201_s28 = scalar_lea.vmem [#allocation6], %s505_s21 }
  0x2e   : > { %v211_v4 = vrot.slane %v210_v2, 4  ;;  %v225_v5 = vrot.slane %v224_v3, 4  ;;  %v249_v24 = vshrl.u32 %v248_v14, 7  ;;  %s356_s27 = sshll.u32 %s194_s26, 4  ;;  %s372_s29 = sshll.u32 %s201_s28, 4  ;;  %vm262_vm1 = vcmp.lt.s32.totalorder %v248_v14, 256  ;;  %s842_s27 = int_to_ptr.vmem [resolvable:$true] %s356_s27  ;;  %s844_s29 = int_to_ptr.vmem [resolvable:$true] %s372_s29 }
  0x2f   : > { %v217_v6 = vsel %vm209_vm0, %v207_v1, 0.0  ;;  %v231_v7 = vsel %vm209_vm0, %v207_v1, -inf  ;;  %v247_v23 = vunpack.c.0.s8 %v246_v13  ;;  %s516_s30 = sshll.u32 %s717_s12, 5  ;;  %s335_s8 = scalar_lea.sflag [#allocation4], %s832_s18 }
  0x30   : > { %v212_v8 = vadd.f32 %v211_v4, %v210_v2  ;;  %v218_v9 = vrot.slane %v217_v6, 4  ;;  %v226_v10 = vmax.f32 %v224_v3, %v225_v5  ;;  %v232_v11 = vrot.slane %v231_v7, 4  ;;  %s849_s5 = scalar_lea.hbm %s922_s1, %s516_s30  ;;  %s854_s12 = scalar_lea.hbm %s923_s2, %s516_s30 }
  0x31   : > { %v250_v34 = vsub.s32 %v247_v23, %v249_v24  ;;  %s615_s15 = scalar_lea.vmem %s842_s27, 32  ;;  %s729_s16 = smov [#allocation5]  }
  0x32   : > { %v213_v15 = vrot.slane %v212_v8, 2  ;;  %v219_v16 = vadd.f32 %v218_v9, %v217_v6  ;;  %v227_v17 = vrot.slane %v226_v10, 2  ;;  %v233_v18 = vmax.f32 %v231_v7, %v232_v11  ;;  %p616_p8 = scmp.ne.s32.totalorder %s842_s27, %s615_s15  ;;  %s619_s19 = sshll.u32 %s729_s16, 4  ;;  %s620_s19 = int_to_ptr.vmem [resolvable:$false] %s619_s19 }
  0x33   : > { %s621_s20 = scalar_lea.vmem %s620_s19, 64  ;;  %p622_p0 = scmp.lt.s32.totalorder %s842_s27, %s620_s19 }
  0x34   : > { %v214_v19 = vadd.f32 %v213_v15, %v212_v8  ;;  %v220_v20 = vrot.slane %v219_v16, 2  ;;  %v228_v21 = vmax.f32 %v226_v10, %v227_v17  ;;  %v234_v22 = vrot.slane %v233_v18, 2  ;;  %p617_p11 = pnand %p616_p8, %p797_p9  ;;  %p623_p1 = scmp.lt.s32.totalorder %s621_s20, %s615_s15 }
  0x36   : > { %v215_v25 = vrot.slane %v214_v19, 1  ;;  %v221_v26 = vadd.f32 %v220_v20, %v219_v16  ;;  %v229_v27 = vrot.slane %v228_v21, 1  ;;  %v235_v28 = vmax.f32 %v233_v18, %v234_v22  ;;  %p618_p12 = pneg %p617_p11  ;;  %p624_p2 = por %p623_p1, %p622_p0 }
  0x38   : > { %v216_v29 = vadd.f32 %v215_v25, %v214_v19  ;;  %v222_v30 = vrot.slane %v221_v26, 1  ;;  %v230_v31 = vmax.f32 %v228_v21, %v229_v27  ;;  %v236_v32 = vrot.slane %v235_v28, 1  ;;  %p625_p3 = pnand %p624_p2, %p618_p12 }
  0x3a   : > { %v223_v33 = vadd.f32 %v222_v30, %v221_v26  ;;  %v237_v35 = vmax.f32 %v235_v28, %v236_v32 }
  0x3c   : > { %v244_v36 = vcombine.low %v216_v29, %v223_v33  ;;  %v267_v37 = vcombine.low %v230_v31, %v237_v35 }
  0x3e   : > { %v251_v38 = vrot.slane %v244_v36, %v250_v34  ;;  %v274_v39 = vrot.slane %v267_v37, %v250_v34 }
  0x40   : > { %v258_v40 = vrot.slane %v251_v38, %v250_v34  ;;  %v281_v41 = vrot.slane %v274_v39, %v250_v34 }
  0x42   : > { %264 = vst.msk [vmem:[%s194_s26] sm:$0x3] %vm262_vm1, %v258_v40  ;;  %283 = vst.msk [vmem:[%s201_s28] sm:$0x3] %vm262_vm1, %v281_v41 }
  0x43   : > { %628 = shalt.err (!%p625_p3)
}
  0x44   : > { %s629_s25 = scalar_lea.hbm %s849_s5, 32  ;;  %s633_s28 = scalar_lea.hbm %s922_s1, 64 }
  0x45   : > { %p630_p5 = scmp.ne.s32.totalorder %s849_s5, %s629_s25  ;;  %p634_p10 = scmp.lt.s32.totalorder %s849_s5, %s922_s1 }
  0x46   : > { %p635_p4 = scmp.lt.s32.totalorder %s633_s28, %s629_s25 }
  0x47   : > { %p631_p6 = pnand %p630_p5, %p797_p9 }
  0x48   : > { %p636_p13 = por %p635_p4, %p634_p10 }
  0x49   : > { %p632_p7 = pneg %p631_p6 }
  0x4b   : > { %p637_p8 = pnand %p636_p13, %p632_p7 }
  0x4d   : > { %640 = shalt.err (!%p637_p8)
}
  0x4e   : > { %520 = dma.vmem_to_hbm [thread:$0]  (%p797_p9), %s842_s27, 32, %s849_s5, %s335_s8  }
  0x4f   : > { %s340_s4 = scalar_lea.sflag [#allocation7], %s832_s18  ;;  %s641_s6 = scalar_lea.vmem %s844_s29, 32 }
  0x50   : > { %p642_p11 = scmp.ne.s32.totalorder %s844_s29, %s641_s6  ;;  %s730_s7 = smov [#allocation6]  }
  0x51   : > { %s645_s15 = sshll.u32 %s730_s7, 4  ;;  %s646_s15 = int_to_ptr.vmem [resolvable:$false] %s645_s15 }
  0x52   : > { %p643_p12 = pnand %p642_p11, %p797_p9  ;;  %s647_s16 = scalar_lea.vmem %s646_s15, 64 }
  0x53   : > { %p648_p1 = scmp.lt.s32.totalorder %s844_s29, %s646_s15  ;;  %p649_p2 = scmp.lt.s32.totalorder %s647_s16, %s641_s6 }
  0x54   : > { %p644_p0 = pneg %p643_p12 }
  0x55   : > { %p650_p3 = por %p649_p2, %p648_p1 }
  0x57   : > { %p651_p5 = pnand %p650_p3, %p644_p0 }
  0x59   : > { %654 = shalt.err (!%p651_p5)
}
  0x5a   : > { %s655_s27 = scalar_lea.hbm %s854_s12, 32  ;;  %s659_s8 = scalar_lea.hbm %s923_s2, 64 }
  0x5b   : > { %p656_p6 = scmp.ne.s32.totalorder %s854_s12, %s655_s27  ;;  %p660_p4 = scmp.lt.s32.totalorder %s854_s12, %s923_s2 }
  0x5c   : > { %p661_p13 = scmp.lt.s32.totalorder %s659_s8, %s655_s27 }
  0x5d   : > { %p657_p7 = pnand %p656_p6, %p797_p9 }
  0x5e   : > { %p662_p8 = por %p661_p13, %p660_p4 }
  0x5f   : > { %p658_p10 = pneg %p657_p7 }
  0x61   : > { %p663_p11 = pnand %p662_p8, %p658_p10 }
  0x63   : > { %666 = shalt.err (!%p663_p11)
}
  0x64   : > { %521 = dma.vmem_to_hbm [thread:$0]  (%p797_p9), %s844_s29, 32, %s854_s12, %s340_s4  }
  0x65 PF: > { %s384_s25 = sand.u32 1, %s705_s9   ;;  %p929_p12 = scmp.ne.s32.totalorder %s927_s24, 0 }
  0x66   : > { %p930_p0 = scmp.ge.s32.totalorder %s725_s14, 2  ;;  %s385_s21 = scalar_lea.sflag [#allocation4], %s384_s25 }
  0x68   : > { %p529_p1 = pnand %p930_p0, %p929_p12 }
  0x6a   : > { %p530_p2 = pneg %p529_p1 }
  0x6c   : > { %696 = dma.done.wait (%p530_p2), %s385_s21, 32  }
  0x6d   : > { %698 = vsyncadd (%p530_p2), %s385_s21, 4294967264  ;;  %s394_s26 = scalar_lea.sflag [#allocation7], %s384_s25 }
  0x6e   : > { %700 = dma.done.wait (%p530_p2), %s394_s26, 32  }
  0x6f   : > { %702 = vsyncadd (%p530_p2), %s394_s26, 4294967264  ;;  %s22_s14 = sadd.s32 1, %s725_s14   ;;  %s931_s9 = smov %s709_s10 }
  0x70   : > { %p19_p3 = scmp.ge.s32.totalorder %s22_s14, 4   ;;  %s932_s10 = smov %s713_s11 }
  0x71   : > { %s933_s11 = smov %s802_s23  ;;  %s934_s12 = smov %s721_s13 }
  0x72   : > { %s935_s13 = smov %s937_s17  ;;  %21 = sbr.rel (!%p19_p3) target bundleno = 8 (0x8), region = 94 }
  0x77   :  { %399 = vsyncpa [#allocation3], 1 }
  0x78   :  { %401 = vsyncpa [#allocation3 + $0x1], 1 }
  0x79   :  { %402 = vsyncpa [#allocation4], 1 }
  0x7a   :  { %404 = vsyncpa [#allocation4 + $0x1], 1 }
  0x7b   :  { %405 = vsyncpa [#allocation7], 1 }
  0x7c   :  { %407 = vsyncpa [#allocation7 + $0x1], 1 }

</bundles_post_ra>
